<compile_context>
chip_gen: v7x
topology: tpu7x:2x2x1
jax: 0.10.0
libtpu: 0.0.40
codegen_flags: <defaults>
</compile_context>

<pallas_src>
import jax
import jax.numpy as jnp
import numpy as np
from jax.experimental import pallas as pl
from jax.experimental.pallas import tpu as pltpu


def _fix_visual_prompt_kernel(x_ref, prompt_ref, scale_ref, bias_ref, o_ref):
    # x_ref:      (B_tile, F)  zero-padded image rows, F = 3*Hout*Wout
    # prompt_ref: (1, F)       sigmoid(program) * mask, flattened
    # scale_ref:  (1, F)       1/std  broadcast per channel, flattened
    # bias_ref:   (1, F)       -mean/std broadcast per channel, flattened
    # o_ref:      (B_tile, F)
    y = jnp.clip(x_ref[...] + prompt_ref[...], 0.0, 1.0)
    o_ref[...] = (y * scale_ref[...] + bias_ref[...]).astype(o_ref.dtype)


def fix_visual_prompt(x, program, mask, mean, std, *, l_pad, r_pad):
    """x: (N, 3, Hin, Win) float32. Returns (N, 3, Hout, Wout)."""
    n, c, hin, win = x.shape
    c2, hout, wout = program.shape
    assert c == 3 and c2 == 3
    f = c * hout * wout

    # ---- batch-invariant precompute (O(1), independent of N) -------------
    prompt = (jax.nn.sigmoid(program) * mask).reshape(1, f)
    scale = jnp.broadcast_to(1.0 / std, (c, hout, wout)).reshape(1, f)
    bias = jnp.broadcast_to(-mean / std, (c, hout, wout)).reshape(1, f)

    # ---- layout: pad once, flatten to a lane-dense (N, F) view -----------
    xp = jnp.pad(x, ((0, 0), (0, 0), (l_pad, r_pad), (l_pad, r_pad)))
    xp = xp.reshape(n, f)

    # ---- batch tile sized against VMEM (conservative for v7x 64 MiB) -----
    bytes_per_img = f * x.dtype.itemsize
    b_tile = max(1, (4 << 20) // bytes_per_img)      # ~4 MiB input block
    b_tile = min(b_tile, n)
    if n >= 16:
        # keep >= 2 grid steps so both v7x TensorCores get work
        b_tile = min(b_tile, pl.cdiv(n, 2))
    if b_tile >= 8:
        b_tile -= b_tile % 8                         # sublane-dense rows
    b_tile = max(b_tile, 1)
    grid = (pl.cdiv(n, b_tile),)

    out_flat = pl.pallas_call(
        _fix_visual_prompt_kernel,
        out_shape=jax.ShapeDtypeStruct((n, f), x.dtype),
        grid_spec=pltpu.PrefetchScalarGridSpec(
            num_scalar_prefetch=0,
            grid=grid,
            in_specs=[
                pl.BlockSpec((b_tile, f), lambda i: (i, 0)),
                pl.BlockSpec((1, f), lambda i: (0, 0)),
                pl.BlockSpec((1, f), lambda i: (0, 0)),
                pl.BlockSpec((1, f), lambda i: (0, 0)),
            ],
            out_specs=pl.BlockSpec((b_tile, f), lambda i: (i, 0)),
        ),
        compiler_params=pltpu.CompilerParams(
            dimension_semantics=("parallel",)),
    )(xp, prompt, scale, bias)

    return out_flat.reshape(n, c, hout, wout)


def _reference(x, program, mask, mean, std, *, l_pad, r_pad):
    padded = jnp.pad(x, ((0, 0), (0, 0), (l_pad, r_pad), (l_pad, r_pad)))
    y = padded + jax.nn.sigmoid(program)[None] * mask[None]
    y = jnp.clip(y, 0.0, 1.0)
    return (y - mean[None]) / std[None]


if __name__ == "__main__":
    # Module hyperparameters (args.*)
    input_size = 16
    output_size = 32
    mask_size = 8
    l_pad = int((output_size - input_size + 1) / 2)   # 8
    r_pad = int((output_size - input_size) / 2)       # 8

    key = jax.random.PRNGKey(0)
    kx, kp = jax.random.split(key)

    # Input image batch (values in [0, 1], pre-Normalize)
    x = jax.random.uniform(kx, (2, 3, input_size, input_size), jnp.float32)

    # Parameters / buffers (deterministic; program perturbed slightly so that
    # sigmoid != 0.5 everywhere, purely for a more interesting test)
    program = 0.1 * jax.random.normal(kp, (3, output_size, output_size),
                                      jnp.float32)
    mask = jnp.zeros((3, output_size, output_size), jnp.float32)
    mask = mask.at[:, :mask_size, :mask_size].set(1.0)

    # Normalize (torchvision ImageNet stats), shaped for NCHW broadcast.
    mean = jnp.array([0.485, 0.456, 0.406], jnp.float32).reshape(3, 1, 1)
    std = jnp.array([0.229, 0.224, 0.225], jnp.float32).reshape(3, 1, 1)

    out = fix_visual_prompt(x, program, mask, mean, std,
                            l_pad=l_pad, r_pad=r_pad)
    out = jax.block_until_ready(out)

    ref = _reference(x, program, mask, mean, std, l_pad=l_pad, r_pad=r_pad)
    np.testing.assert_allclose(np.asarray(out), np.asarray(ref),
                               rtol=1e-5, atol=1e-5)

    print("KERNEL_OK")
</pallas_src>

<mosaic_0001>
module attributes {stable_mosaic.version = 11 : i64} {
  func.func @_fix_visual_prompt_kernel(%arg0: i32, %arg1: memref<2x3072xf32, #tpu.memory_space<vmem>>, %arg2: memref<1x3072xf32, #tpu.memory_space<vmem>>, %arg3: memref<1x3072xf32, #tpu.memory_space<vmem>>, %arg4: memref<1x3072xf32, #tpu.memory_space<vmem>>, %arg5: memref<2x3072xf32, #tpu.memory_space<vmem>>) attributes {dimension_semantics = [#tpu.dimension_semantics<parallel>], iteration_bounds = array<i64: 1>, scalar_prefetch = 0 : i64, scratch_operands = 0 : i64, tpu.core_type = #tpu.core_type<tc>, window_params = [{transform_indices = @transform_0, window_bounds = array<i64: 2, 3072>}, {pipeline_mode = #tpu.pipeline_mode<synchronous>, transform_indices = @transform_1, window_bounds = array<i64: 1, 3072>}, {pipeline_mode = #tpu.pipeline_mode<synchronous>, transform_indices = @transform_2, window_bounds = array<i64: 1, 3072>}, {pipeline_mode = #tpu.pipeline_mode<synchronous>, transform_indices = @transform_3, window_bounds = array<i64: 1, 3072>}, {transform_indices = @transform_4, window_bounds = array<i64: 2, 3072>}]} {
    %c0 = arith.constant 0 : index
    %c0_0 = arith.constant 0 : index
    %0 = vector.load %arg1[%c0, %c0_0] : memref<2x3072xf32, #tpu.memory_space<vmem>>, vector<2x3072xf32>
    %c0_1 = arith.constant 0 : index
    %c0_2 = arith.constant 0 : index
    %1 = vector.load %arg2[%c0_1, %c0_2] : memref<1x3072xf32, #tpu.memory_space<vmem>>, vector<1x3072xf32>
    %2 = vector.broadcast %1 : vector<1x3072xf32> to vector<2x3072xf32>
    %3 = arith.addf %0, %2 : vector<2x3072xf32>
    %cst = arith.constant 0.000000e+00 : f32
    %cst_3 = arith.constant 1.000000e+00 : f32
    %4 = vector.broadcast %cst : f32 to vector<2x3072xf32>
    %5 = arith.maximumf %4, %3 : vector<2x3072xf32>
    %6 = vector.broadcast %cst_3 : f32 to vector<2x3072xf32>
    %7 = arith.minimumf %6, %5 : vector<2x3072xf32>
    %c0_4 = arith.constant 0 : index
    %c0_5 = arith.constant 0 : index
    %8 = vector.load %arg3[%c0_4, %c0_5] : memref<1x3072xf32, #tpu.memory_space<vmem>>, vector<1x3072xf32>
    %9 = vector.broadcast %8 : vector<1x3072xf32> to vector<2x3072xf32>
    %10 = arith.mulf %7, %9 : vector<2x3072xf32>
    %c0_6 = arith.constant 0 : index
    %c0_7 = arith.constant 0 : index
    %11 = vector.load %arg4[%c0_6, %c0_7] : memref<1x3072xf32, #tpu.memory_space<vmem>>, vector<1x3072xf32>
    %12 = vector.broadcast %11 : vector<1x3072xf32> to vector<2x3072xf32>
    %13 = arith.addf %10, %12 : vector<2x3072xf32>
    %c0_8 = arith.constant 0 : index
    %c0_9 = arith.constant 0 : index
    %14 = vector.load %arg5[%c0_8, %c0_9] : memref<2x3072xf32, #tpu.memory_space<vmem>>, vector<2x3072xf32>
    tpu.vector_store %arg5[%c0_8, %c0_9], %13 {strides = array<i32>} : memref<2x3072xf32, #tpu.memory_space<vmem>>, vector<2x3072xf32>,
    return
  }
  func.func @transform_0(%arg0: i32) -> (i32, i32) {
    %c0_i32 = arith.constant 0 : i32
    %c0_i32_0 = arith.constant 0 : i32
    return %arg0, %c0_i32 : i32, i32
  }
  func.func @transform_1(%arg0: i32) -> (i32, i32) {
    %c0_i32 = arith.constant 0 : i32
    %c0_i32_0 = arith.constant 0 : i32
    %c0_i32_1 = arith.constant 0 : i32
    return %c0_i32, %c0_i32_0 : i32, i32
  }
  func.func @transform_2(%arg0: i32) -> (i32, i32) {
    %c0_i32 = arith.constant 0 : i32
    %c0_i32_0 = arith.constant 0 : i32
    %c0_i32_1 = arith.constant 0 : i32
    return %c0_i32, %c0_i32_0 : i32, i32
  }
  func.func @transform_3(%arg0: i32) -> (i32, i32) {
    %c0_i32 = arith.constant 0 : i32
    %c0_i32_0 = arith.constant 0 : i32
    %c0_i32_1 = arith.constant 0 : i32
    return %c0_i32, %c0_i32_0 : i32, i32
  }
  func.func @transform_4(%arg0: i32) -> (i32, i32) {
    %c0_i32 = arith.constant 0 : i32
    %c0_i32_0 = arith.constant 0 : i32
    return %arg0, %c0_i32 : i32, i32
  }
}

</mosaic_0001>

<bundles_post_ra>
// kernel: tpu_custom_call.1
= control target key start
LH: loop header
LB: loop body
LE: loop exit
PB: predicated region body
PF: predicated region fallthrough
CT: control target
= control target key end

     0   :  { %9 = vsyncpa [#allocation3], 0  ;;  %s1125_s0 = inlined_call_operand.hbm [shape: f32[2,3072], index: 0, kind: input, shape index: {}]   ;;  %s1126_s1 = inlined_call_operand.hbm [shape: f32[1,3072], index: 1, kind: input, shape index: {}]   ;;  %s1127_s2 = inlined_call_operand.hbm [shape: f32[1,3072], index: 2, kind: input, shape index: {}]   ;;  %s1128_s3 = inlined_call_operand.hbm [shape: f32[1,3072], index: 3, kind: input, shape index: {}]   ;;  %s1129_s4 = inlined_call_operand.hbm [shape: f32[2,3072], index: 4, kind: output, shape index: {}]  }
   0x1   :  { %10 = vsyncpa [#allocation6], 0 }
   0x2   :  { %11 = vsyncpa [#allocation9], 0 }
   0x3   :  { %12 = vsyncpa [#allocation4], 0  ;;  %s878_s15 = smov [#allocation5]   ;;  %s879_s17 = smov [#allocation2]  }
   0x4   :  { %s29_s16 = sshll.u32 %s878_s15, 4  ;;  %s19_s18 = sshll.u32 %s879_s17, 4  ;;  %s30_s16 = int_to_ptr.vmem [resolvable:$true] %s29_s16  ;;  %s20_s18 = int_to_ptr.vmem [resolvable:$true] %s19_s18 }
   0x5   :  { %s760_s21 = scalar_lea.hbm %s1126_s1, 384 }
   0x6   :  { %p761_p0 = scmp.ne.s32.totalorder %s1126_s1, %s760_s21  ;;  %p764_p1 = scmp.lt.u32.totalorder %s760_s21, %s1126_s1 }
   0x8   :  { %p766_p2 = pnand %p764_p1, %p761_p0 }
   0xa   :  { %769 = shalt.err (!%p766_p2)
}
   0xb   :  { %s770_s26 = scalar_lea.vmem %s30_s16, 384  ;;  %p775_p4 = scmp.lt.s32.totalorder %s30_s16, %s30_s16 }
   0xc   :  { %p771_p3 = scmp.ne.s32.totalorder %s30_s16, %s770_s26  ;;  %p776_p5 = scmp.lt.s32.totalorder %s770_s26, %s770_s26 }
   0xe   :  { %p777_p6 = por %p776_p5, %p775_p4 }
  0x10   :  { %p778_p7 = pnand %p777_p6, %p771_p3 }
  0x12   :  { %781 = shalt.err (!%p778_p7)
}
  0x13   :  { %32 = dma.hbm_to_vmem [thread:$0]  %s1126_s1, 384, %s30_s16, [#allocation6]  }
  0x14   :  { %s782_s5 = scalar_lea.hbm %s1125_s0, 768 }
  0x15   :  { %p783_p8 = scmp.ne.s32.totalorder %s1125_s0, %s782_s5  ;;  %p786_p9 = scmp.lt.u32.totalorder %s782_s5, %s1125_s0 }
  0x17   :  { %p788_p10 = pnand %p786_p9, %p783_p8 }
  0x19   :  { %791 = shalt.err (!%p788_p10)
}
  0x1a   :  { %s792_s10 = scalar_lea.vmem %s20_s18, 768  ;;  %p797_p12 = scmp.lt.s32.totalorder %s20_s18, %s20_s18 }
  0x1b   :  { %p793_p11 = scmp.ne.s32.totalorder %s20_s18, %s792_s10  ;;  %p798_p13 = scmp.lt.s32.totalorder %s792_s10, %s792_s10 }
  0x1d   :  { %p799_p0 = por %p798_p13, %p797_p12 }
  0x1f   :  { %p800_p1 = pnand %p799_p0, %p793_p11 }
  0x21   :  { %803 = shalt.err (!%p800_p1)
}
  0x22   :  { %22 = dma.hbm_to_vmem [thread:$0]  %s1125_s0, 768, %s20_s18, [#allocation3]  }
  0x23   :  { %s880_s12 = smov [#allocation7]   ;;  %s881_s14 = smov [#allocation8]  }
  0x24   :  { %s39_s13 = sshll.u32 %s880_s12, 4  ;;  %s49_s15 = sshll.u32 %s881_s14, 4  ;;  %s40_s13 = int_to_ptr.vmem [resolvable:$true] %s39_s13  ;;  %s50_s15 = int_to_ptr.vmem [resolvable:$true] %s49_s15 }
  0x25   :  { %s804_s19 = scalar_lea.hbm %s1127_s2, 384 }
  0x26   :  { %p805_p2 = scmp.ne.s32.totalorder %s1127_s2, %s804_s19  ;;  %p808_p3 = scmp.lt.u32.totalorder %s804_s19, %s1127_s2 }
  0x28   :  { %p810_p4 = pnand %p808_p3, %p805_p2 }
  0x2a   :  { %813 = shalt.err (!%p810_p4)
}
  0x2b   :  { %s814_s0 = scalar_lea.vmem %s40_s13, 384  ;;  %p819_p6 = scmp.lt.s32.totalorder %s40_s13, %s40_s13 }
  0x2c   :  { %p815_p5 = scmp.ne.s32.totalorder %s40_s13, %s814_s0  ;;  %p820_p7 = scmp.lt.s32.totalorder %s814_s0, %s814_s0 }
  0x2e   :  { %p821_p8 = por %p820_p7, %p819_p6 }
  0x30   :  { %p822_p9 = pnand %p821_p8, %p815_p5 }
  0x32   :  { %825 = shalt.err (!%p822_p9)
}
  0x33   :  { %42 = dma.hbm_to_vmem [thread:$0]  %s1127_s2, 384, %s40_s13, [#allocation6]  }
  0x34   :  { %s826_s27 = scalar_lea.hbm %s1128_s3, 384 }
  0x35   :  { %p827_p10 = scmp.ne.s32.totalorder %s1128_s3, %s826_s27  ;;  %p830_p11 = scmp.lt.u32.totalorder %s826_s27, %s1128_s3 }
  0x37   :  { %p832_p12 = pnand %p830_p11, %p827_p10 }
  0x39   :  { %835 = shalt.err (!%p832_p12)
}
  0x3a   :  { %s836_s6 = scalar_lea.vmem %s50_s15, 384  ;;  %p841_p0 = scmp.lt.s32.totalorder %s50_s15, %s50_s15 }
  0x3b   :  { %p837_p13 = scmp.ne.s32.totalorder %s50_s15, %s836_s6  ;;  %p842_p1 = scmp.lt.s32.totalorder %s836_s6, %s836_s6 }
  0x3d   :  { %p843_p2 = por %p842_p1, %p841_p0 }
  0x3f   :  { %p844_p3 = pnand %p843_p2, %p837_p13 }
  0x41   :  { %847 = shalt.err (!%p844_p3)
}
  0x42   :  { %52 = dma.hbm_to_vmem [thread:$0]  %s1128_s3, 384, %s50_s15, [#allocation9]  }
  0x43   :  { %870 = dma.done.wait [#allocation3], 768  }
  0x44   :  { %871 = vsyncadd [#allocation3], 4294966528 }
  0x45   :  { %872 = dma.done.wait [#allocation6], 768  }
  0x46   :  { %873 = vsyncadd [#allocation6], 4294966528 }
  0x47   :  { %874 = dma.done.wait [#allocation9], 384  }
  0x48   :  { %875 = vsyncadd [#allocation9], 4294966912  ;;  %v77_v0 = vlaneseq  ;;  %v882_v1 = vmov 1983009808   ;;  %v71_v10 = vld [vmem:[#allocation5] sm:$0xff]  ;;  %v299_v11 = vld [vmem:[#allocation7] sm:$0xff] }
  0x49   :  { %v176_v2 = vunpack.c.l.s4 %v882_v1  ;;  %v515_v20 = vld [vmem:[#allocation8] sm:$0xff]  ;;  %v1000_v54 = vld [vmem:[#allocation5 + $0x8] sm:$0xff]  ;;  %v66_v63 = vld [vmem:[#allocation2 + $0x8] sm:$0xff]  ;;  %s883_s3 = smov [#allocation10]  }
  0x4a   :  { %v78_v3 = vshrl.u32 %v77_v0, 7  ;;  %v65_v37 = vld [vmem:[#allocation2] sm:$0xff]  ;;  %s743_s8 = sshll.u32 %s883_s3, 4  ;;  %s744_s8 = int_to_ptr.vmem [resolvable:$true] %s743_s8 }
  0x4b   :  { %v177_v4 = vunpack.c.0.s8 %v176_v2  ;;  %s848_s9 = scalar_lea.vmem %s744_s8, 768  ;;  %p853_p5 = scmp.lt.s32.totalorder %s744_s8, %s744_s8 }
  0x4c   :  { %v957_v5 = vsub.s32 0, %v78_v3  ;;  %v959_v6 = vsub.s32 1, %v78_v3  ;;  %v961_v7 = vsub.s32 2, %v78_v3  ;;  %v963_v8 = vsub.s32 3, %v78_v3  ;;  %p849_p4 = scmp.ne.s32.totalorder %s744_s8, %s848_s9  ;;  %p854_p6 = scmp.lt.s32.totalorder %s848_s9, %s848_s9 }
  0x4d   :  { %v965_v9 = vsub.s32 %v177_v4, %v78_v3  ;;  %v967_v12 = vsub.s32 4, %v78_v3  ;;  %v969_v13 = vsub.s32 5, %v78_v3  ;;  %v971_v14 = vsub.s32 6, %v78_v3 }
  0x4e   :  { %v973_v15 = vsub.s32 7, %v78_v3  ;;  %v80_v16 = vrot.slane %v71_v10, %v957_v5  ;;  %v84_v17 = vrot.slane %v71_v10, %v959_v6  ;;  %v88_v18 = vrot.slane %v71_v10, %v961_v7  ;;  %p855_p7 = por %p854_p6, %p853_p5 }
  0x4f   :  { %v92_v19 = vrot.slane %v71_v10, %v963_v8  ;;  %v308_v21 = vrot.slane %v299_v11, %v957_v5  ;;  %v312_v22 = vrot.slane %v299_v11, %v959_v6  ;;  %v316_v23 = vrot.slane %v299_v11, %v961_v7 }
  0x50   :  { %v320_v24 = vrot.slane %v299_v11, %v963_v8  ;;  %v173_v25 = vcombine.low %v80_v16, %v84_v17  ;;  %v524_v27 = vrot.slane %v515_v20, %v957_v5  ;;  %v528_v28 = vrot.slane %v515_v20, %v959_v6  ;;  %v1012_v17 = vld [vmem:[#allocation7 + $0x8] sm:$0xff]  ;;  %p856_p8 = pnand %p855_p7, %p849_p4 }
  0x51   :  { %v174_v26 = vcombine.low %v88_v18, %v92_v19  ;;  %v401_v29 = vcombine.low %v308_v21, %v312_v22  ;;  %v532_v31 = vrot.slane %v515_v20, %v961_v7  ;;  %v536_v32 = vrot.slane %v515_v20, %v963_v8 }
  0x52   :  { %v402_v30 = vcombine.low %v316_v23, %v320_v24  ;;  %v181_v33 = vrot.slane %v173_v25, %v965_v9  ;;  %v617_v35 = vcombine.low %v524_v27, %v528_v28  ;;  %v96_v36 = vrot.slane %v71_v10, %v967_v12 }
  0x53   :  { %v188_v34 = vrot.slane %v174_v26, %v965_v9  ;;  %v409_v38 = vrot.slane %v401_v29, %v965_v9  ;;  %v618_v40 = vcombine.low %v532_v31, %v536_v32  ;;  %v100_v41 = vrot.slane %v71_v10, %v969_v13 }
  0x54   :  { %v416_v39 = vrot.slane %v402_v30, %v965_v9  ;;  %v625_v43 = vrot.slane %v617_v35, %v965_v9  ;;  %v104_v44 = vrot.slane %v71_v10, %v971_v14  ;;  %v108_v45 = vrot.slane %v71_v10, %v973_v15  ;;  %v516_v30 = vld [vmem:[#allocation8 + $0x8] sm:$0xff] }
  0x55   :  { %v189_v42 = vcombine.low %v181_v33, %v188_v34  ;;  %v632_v47 = vrot.slane %v618_v40, %v965_v9  ;;  %v190_v48 = vcombine.low %v96_v36, %v100_v41  ;;  %v324_v49 = vrot.slane %v299_v11, %v967_v12 }
  0x56   :  { %v417_v46 = vcombine.low %v409_v38, %v416_v39  ;;  %v191_v51 = vcombine.low %v104_v44, %v108_v45  ;;  %v328_v52 = vrot.slane %v299_v11, %v969_v13  ;;  %v332_v53 = vrot.slane %v299_v11, %v971_v14 }
  0x57   :  { %v281_v50 = vadd.f32 %v189_v42, %v65_v37  ;;  %v633_v55 = vcombine.low %v625_v43, %v632_v47  ;;  %v198_v56 = vrot.slane %v190_v48, %v965_v9  ;;  %v336_v57 = vrot.slane %v299_v11, %v973_v15  ;;  %v67_v43 = vld [vmem:[#allocation2 + $0x10] sm:$0xff] }
  0x58   :  { %v540_v58 = vrot.slane %v515_v20, %v967_v12  ;;  %v205_v60 = vrot.slane %v191_v51, %v965_v9  ;;  %v418_v61 = vcombine.low %v324_v49, %v328_v52  ;;  %v544_v62 = vrot.slane %v515_v20, %v969_v13 }
  0x59   :  { %v287_v59 = vmax.f32 %v281_v50, 0.0  ;;  %v419_v0 = vcombine.low %v332_v53, %v336_v57  ;;  %v548_v1 = vrot.slane %v515_v20, %v971_v14  ;;  %v552_v2 = vrot.slane %v515_v20, %v973_v15 }
  0x5a   :  { %v112_v3 = vrot.slane %v1000_v54, %v957_v5  ;;  %v206_v10 = vcombine.low %v198_v56, %v205_v60  ;;  %v426_v11 = vrot.slane %v418_v61, %v965_v9  ;;  %v634_v16 = vcombine.low %v540_v58, %v544_v62 }
  0x5b   :  { %v293_v4 = vmin.f32 %v287_v59, 1.0  ;;  %v433_v18 = vrot.slane %v419_v0, %v965_v9  ;;  %v635_v19 = vcombine.low %v548_v1, %v552_v2  ;;  %v116_v21 = vrot.slane %v1000_v54, %v959_v6 }
  0x5c   :  { %v120_v22 = vrot.slane %v1000_v54, %v961_v7  ;;  %v282_v23 = vadd.f32 %v206_v10, %v66_v63  ;;  %v642_v24 = vrot.slane %v634_v16, %v965_v9  ;;  %v124_v25 = vrot.slane %v1000_v54, %v963_v8 }
  0x5d   :  { %v509_v20 = vmul.f32 %v417_v46, %v293_v4  ;;  %v434_v26 = vcombine.low %v426_v11, %v433_v18  ;;  %v649_v27 = vrot.slane %v635_v19, %v965_v9  ;;  %v207_v28 = vcombine.low %v112_v3, %v116_v21  ;;  %v1058_v18 = vld [vmem:[#allocation5 + $0x10] sm:$0xff] }
  0x5e   :  { %v340_v29 = vrot.slane %v1012_v17, %v957_v5  ;;  %v288_v32 = vmax.f32 %v282_v23, 0.0  ;;  %v208_v33 = vcombine.low %v120_v22, %v124_v25  ;;  %v344_v34 = vrot.slane %v1012_v17, %v959_v6  ;;  %v68_v23 = vld [vmem:[#allocation2 + $0x18] sm:$0xff] }
  0x5f   :  { %v725_v31 = vadd.f32 %v633_v55, %v509_v20  ;;  %v650_v35 = vcombine.low %v642_v24, %v649_v27  ;;  %v215_v36 = vrot.slane %v207_v28, %v965_v9  ;;  %v348_v37 = vrot.slane %v1012_v17, %v961_v7 }
  0x60   :  { %v352_v38 = vrot.slane %v1012_v17, %v963_v8  ;;  %v294_v39 = vmin.f32 %v288_v32, 1.0  ;;  %v222_v40 = vrot.slane %v208_v33, %v965_v9  ;;  %v435_v41 = vcombine.low %v340_v29, %v344_v34 }
  0x61   :  { %731 = vst [vmem:[#allocation10] sm:$0xff] %v725_v31  ;;  %v556_v42 = vrot.slane %v516_v30, %v957_v5  ;;  %v560_v45 = vrot.slane %v516_v30, %v959_v6  ;;  %v564_v46 = vrot.slane %v516_v30, %v961_v7  ;;  %v568_v47 = vrot.slane %v516_v30, %v963_v8 }
  0x62   :  { %v436_v44 = vcombine.low %v348_v37, %v352_v38  ;;  %v510_v48 = vmul.f32 %v434_v26, %v294_v39  ;;  %v223_v49 = vcombine.low %v215_v36, %v222_v40  ;;  %v443_v50 = vrot.slane %v435_v41, %v965_v9  ;;  %v301_v36 = vld [vmem:[#allocation7 + $0x10] sm:$0xff] }
  0x63   :  { %v128_v51 = vrot.slane %v1000_v54, %v967_v12  ;;  %v651_v53 = vcombine.low %v556_v42, %v560_v45  ;;  %v652_v55 = vcombine.low %v564_v46, %v568_v47  ;;  %v132_v56 = vrot.slane %v1000_v54, %v969_v13 }
  0x64   :  { %v450_v52 = vrot.slane %v436_v44, %v965_v9  ;;  %v726_v57 = vadd.f32 %v650_v35, %v510_v48  ;;  %v283_v58 = vadd.f32 %v223_v49, %v67_v43  ;;  %v136_v59 = vrot.slane %v1000_v54, %v971_v14  ;;  %v517_v44 = vld [vmem:[#allocation8 + $0x10] sm:$0xff] }
  0x65   :  { %v140_v60 = vrot.slane %v1000_v54, %v973_v15  ;;  %v659_v62 = vrot.slane %v651_v53, %v965_v9  ;;  %v666_v63 = vrot.slane %v652_v55, %v965_v9  ;;  %v224_v0 = vcombine.low %v128_v51, %v132_v56 }
  0x66   :  { %v451_v61 = vcombine.low %v443_v50, %v450_v52  ;;  %732 = vst [vmem:[#allocation10 + $0x8] sm:$0xff] %v726_v57  ;;  %v289_v1 = vmax.f32 %v283_v58, 0.0  ;;  %v356_v3 = vrot.slane %v1012_v17, %v967_v12  ;;  %v360_v4 = vrot.slane %v1012_v17, %v969_v13  ;;  %v69_v58 = vld [vmem:[#allocation2 + $0x20] sm:$0xff] }
  0x67   :  { %v225_v2 = vcombine.low %v136_v59, %v140_v60  ;;  %v667_v10 = vcombine.low %v659_v62, %v666_v63  ;;  %v232_v11 = vrot.slane %v224_v0, %v965_v9  ;;  %v364_v54 = vrot.slane %v1012_v17, %v971_v14 }
  0x68   :  { %v368_v16 = vrot.slane %v1012_v17, %v973_v15  ;;  %v295_v19 = vmin.f32 %v289_v1, 1.0  ;;  %v452_v22 = vcombine.low %v356_v3, %v360_v4  ;;  %v572_v20 = vrot.slane %v516_v30, %v967_v12 }
  0x69   :  { %v239_v21 = vrot.slane %v225_v2, %v965_v9  ;;  %v576_v25 = vrot.slane %v516_v30, %v969_v13  ;;  %v580_v26 = vrot.slane %v516_v30, %v971_v14  ;;  %v584_v27 = vrot.slane %v516_v30, %v973_v15 }
  0x6a   :  { %v453_v24 = vcombine.low %v364_v54, %v368_v16  ;;  %v511_v28 = vmul.f32 %v451_v61, %v295_v19  ;;  %v460_v17 = vrot.slane %v452_v22, %v965_v9  ;;  %v144_v31 = vrot.slane %v1058_v18, %v957_v5 }
  0x6b   :  { %v240_v29 = vcombine.low %v232_v11, %v239_v21  ;;  %v668_v33 = vcombine.low %v572_v20, %v576_v25  ;;  %v669_v34 = vcombine.low %v580_v26, %v584_v27  ;;  %v148_v35 = vrot.slane %v1058_v18, %v959_v6 }
  0x6c   :  { %v467_v32 = vrot.slane %v453_v24, %v965_v9  ;;  %v727_v37 = vadd.f32 %v667_v10, %v511_v28  ;;  %v152_v30 = vrot.slane %v1058_v18, %v961_v7  ;;  %v156_v39 = vrot.slane %v1058_v18, %v963_v8 }
  0x6d   :  { %v284_v38 = vadd.f32 %v240_v29, %v68_v23  ;;  %v676_v41 = vrot.slane %v668_v33, %v965_v9  ;;  %v683_v42 = vrot.slane %v669_v34, %v965_v9  ;;  %v241_v43 = vcombine.low %v144_v31, %v148_v35 }
  0x6e   :  { %v468_v40 = vcombine.low %v460_v17, %v467_v32  ;;  %733 = vst [vmem:[#allocation10 + $0x10] sm:$0xff] %v727_v37  ;;  %v242_v46 = vcombine.low %v152_v30, %v156_v39  ;;  %v372_v47 = vrot.slane %v301_v36, %v957_v5  ;;  %v376_v48 = vrot.slane %v301_v36, %v959_v6  ;;  %v70_v32 = vld [vmem:[#allocation2 + $0x28] sm:$0xff] }
  0x6f   :  { %v290_v45 = vmax.f32 %v284_v38, 0.0  ;;  %v684_v49 = vcombine.low %v676_v41, %v683_v42  ;;  %v249_v50 = vrot.slane %v241_v43, %v965_v9  ;;  %v380_v51 = vrot.slane %v301_v36, %v961_v7 }
  0x70   :  { %v384_v52 = vrot.slane %v301_v36, %v963_v8  ;;  %v256_v55 = vrot.slane %v242_v46, %v965_v9  ;;  %v469_v56 = vcombine.low %v372_v47, %v376_v48  ;;  %v588_v57 = vrot.slane %v517_v44, %v957_v5 }
  0x71   :  { %v296_v53 = vmin.f32 %v290_v45, 1.0  ;;  %v592_v60 = vrot.slane %v517_v44, %v959_v6  ;;  %v596_v61 = vrot.slane %v517_v44, %v961_v7  ;;  %v600_v62 = vrot.slane %v517_v44, %v963_v8 }
  0x72   :  { %v470_v59 = vcombine.low %v380_v51, %v384_v52  ;;  %v257_v0 = vcombine.low %v249_v50, %v256_v55  ;;  %v477_v1 = vrot.slane %v469_v56, %v965_v9  ;;  %v160_v2 = vrot.slane %v1058_v18, %v967_v12 }
  0x73   :  { %v512_v63 = vmul.f32 %v468_v40, %v296_v53  ;;  %v685_v4 = vcombine.low %v588_v57, %v592_v60  ;;  %v686_v10 = vcombine.low %v596_v61, %v600_v62  ;;  %v164_v5 = vrot.slane %v1058_v18, %v969_v13 }
  0x74   :  { %v484_v3 = vrot.slane %v470_v59, %v965_v9  ;;  %v285_v6 = vadd.f32 %v257_v0, %v69_v58  ;;  %v168_v7 = vrot.slane %v1058_v18, %v971_v14  ;;  %v172_v8 = vrot.slane %v1058_v18, %v973_v15 }
  0x75   :  { %v728_v11 = vadd.f32 %v684_v49, %v512_v63  ;;  %v693_v16 = vrot.slane %v685_v4, %v965_v9  ;;  %v700_v19 = vrot.slane %v686_v10, %v965_v9  ;;  %v258_v21 = vcombine.low %v160_v2, %v164_v5 }
  0x76   :  { %v485_v54 = vcombine.low %v477_v1, %v484_v3  ;;  %v291_v22 = vmax.f32 %v285_v6, 0.0  ;;  %v259_v20 = vcombine.low %v168_v7, %v172_v8  ;;  %v388_v23 = vrot.slane %v301_v36, %v967_v12 }
  0x77   :  { %734 = vst [vmem:[#allocation10 + $0x18] sm:$0xff] %v728_v11  ;;  %v392_v24 = vrot.slane %v301_v36, %v969_v13  ;;  %v701_v25 = vcombine.low %v693_v16, %v700_v19  ;;  %v266_v26 = vrot.slane %v258_v21, %v965_v9  ;;  %v396_v27 = vrot.slane %v301_v36, %v971_v14 }
  0x78   :  { %v400_v18 = vrot.slane %v301_v36, %v973_v15  ;;  %v297_v28 = vmin.f32 %v291_v22, 1.0  ;;  %v273_v29 = vrot.slane %v259_v20, %v965_v9  ;;  %v604_v31 = vrot.slane %v517_v44, %v967_v12 }
  0x79   :  { %v486_v17 = vcombine.low %v388_v23, %v392_v24  ;;  %v608_v34 = vrot.slane %v517_v44, %v969_v13  ;;  %v612_v35 = vrot.slane %v517_v44, %v971_v14  ;;  %v616_v37 = vrot.slane %v517_v44, %v973_v15 }
  0x7a   :  { %v487_v33 = vcombine.low %v396_v27, %v400_v18  ;;  %v513_v38 = vmul.f32 %v485_v54, %v297_v28  ;;  %v274_v30 = vcombine.low %v266_v26, %v273_v29 }
  0x7b   :  { %v494_v39 = vrot.slane %v486_v17, %v965_v9  ;;  %v702_v40 = vcombine.low %v604_v31, %v608_v34  ;;  %v703_v41 = vcombine.low %v612_v35, %v616_v37 }
  0x7c   :  { %v501_v36 = vrot.slane %v487_v33, %v965_v9  ;;  %v729_v42 = vadd.f32 %v701_v25, %v513_v38  ;;  %v286_v43 = vadd.f32 %v274_v30, %v70_v32 }
  0x7d   :  { %v710_v12 = vrot.slane %v702_v40, %v965_v9  ;;  %v717_v45 = vrot.slane %v703_v41, %v965_v9 }
  0x7e   :  { %735 = vst [vmem:[#allocation10 + $0x20] sm:$0xff] %v729_v42  ;;  %v292_v13 = vmax.f32 %v286_v43, 0.0  ;;  %v502_v46 = vcombine.low %v494_v39, %v501_v36 }
  0x7f   :  { %v718_v47 = vcombine.low %v710_v12, %v717_v45 }
  0x80   :  { %v298_v14 = vmin.f32 %v292_v13, 1.0 }
  0x82   :  { %v514_v15 = vmul.f32 %v502_v46, %v298_v14 }
  0x84   :  { %v730_v44 = vadd.f32 %v718_v47, %v514_v15 }
  0x86   :  { %736 = vst [vmem:[#allocation10 + $0x28] sm:$0xff] %v730_v44 }
  0x87   :  { %859 = shalt.err (!%p856_p8)
}
  0x88   :  { %s860_s11 = scalar_lea.hbm %s1129_s4, 768 }
  0x89   :  { %p861_p9 = scmp.ne.s32.totalorder %s1129_s4, %s860_s11  ;;  %p864_p10 = scmp.lt.u32.totalorder %s860_s11, %s1129_s4 }
  0x8b   :  { %p866_p11 = pnand %p864_p10, %p861_p9 }
  0x8d   :  { %869 = shalt.err (!%p866_p11)
}
  0x8e   :  { %746 = dma.vmem_to_hbm [thread:$0]  %s744_s8, 768, %s1129_s4, [#allocation4]  }
  0x8f   :  { %876 = dma.done.wait [#allocation4], 768  }
  0x90   :  { %877 = vsyncadd [#allocation4], 4294966528 }
  0x91   :  { %750 = vsyncpa [#allocation3], 1 }
  0x92   :  { %751 = vsyncpa [#allocation6], 1 }
  0x93   :  { %752 = vsyncpa [#allocation9], 1 }
  0x94   :  { %753 = vsyncpa [#allocation4], 1 }

</bundles_post_ra>
